<compile_context>
chip_gen: v6e
topology: v6e:2x2x1
jax: 0.10.0
libtpu: 0.0.40
codegen_flags: <defaults>
</compile_context>

<pallas_src>
import functools

import jax
import jax.numpy as jnp
from jax.experimental import pallas as pl
from jax.experimental.pallas import tpu as pltpu


def _round_up(x, m):
    return (x + m - 1) // m * m


def convlstm_cell_kernel(comb_ref, c_ref, w_ref, b_ref, out_ref,
                         *, H, W, KH, KW, Ctp, hid):
    # comb_ref : (1, Ctp, HWp)  bf16  concat([x, h]) -- channels on sublanes,
    #                                 flattened + zero lane-padded H*W on lanes
    # c_ref    : (1, hid, HW)   f32
    # w_ref    : (4*hid, K)     bf16  K = KH*KW*Ctp, column order (dy, dx, c)
    # b_ref    : (4*hid, 1)     f32
    # out_ref  : (1, 2*hid, HW)       rows [0:hid)=h_next, [hid:2*hid)=c_next
    HW = H * W
    ph, pw = KH // 2, KW // 2
    pad_lo = ph * W + pw

    comb = comb_ref[0]                                     # (Ctp, HWp) bf16

    # x-coordinate of each output lane; only horizontal out-of-range taps need
    # masking (vertical out-of-range windows fall inside the zero lane pad).
    lane = jax.lax.broadcasted_iota(jnp.int32, (1, HW), 1)
    x_idx = lane % W

    # Build the im2col patch (K, HW) from statically shifted lane windows.
    taps = []
    for dy in range(KH):
        for dx in range(KW):
            oy, ox = dy - ph, dx - pw
            off = pad_lo + oy * W + ox                     # static python int
            src = comb[:, off:off + HW]                    # (Ctp, HW) bf16
            if ox != 0:
                valid = (x_idx + ox >= 0) & (x_idx + ox < W)
                src = jnp.where(valid, src, jnp.zeros_like(src))
            taps.append(src)
    patch = jnp.concatenate(taps, axis=0)                  # (K, HW) bf16

    # Single MXU matmul: bf16 inputs, f32 accumulation; add bias.
    acc = jnp.dot(w_ref[...], patch,
                  preferred_element_type=jnp.float32)      # (4*hid, HW) f32
    acc = acc + b_ref[...]                                 # (4*hid, 1) broadcast

    # Gate order matches torch.split: [i, f, o, g]; slices are sublane-aligned.
    cc_i = acc[0 * hid:1 * hid]
    cc_f = acc[1 * hid:2 * hid]
    cc_o = acc[2 * hid:3 * hid]
    cc_g = acc[3 * hid:4 * hid]

    i = jax.nn.sigmoid(cc_i)
    f = jax.nn.sigmoid(cc_f)
    o = jax.nn.sigmoid(cc_o)
    g = jnp.tanh(cc_g)

    c_cur = c_ref[0].astype(jnp.float32)                   # (hid, HW) f32
    c_next = f * c_cur + i * g
    h_next = o * jnp.tanh(c_next)

    # Single lane-dense store: h | c stacked on sublanes.
    out_ref[0] = jnp.concatenate([h_next, c_next], axis=0).astype(out_ref.dtype)


def convlstm_cell_forward(x_nchw, h_nchw, c_nchw, w_oihw, bias):
    """Pallas ConvLSTMCell forward. Inputs/outputs use PyTorch NCHW layout."""
    B, Cin, H, W = x_nchw.shape
    hid = h_nchw.shape[1]
    four_hid, Ct_w, KH, KW = w_oihw.shape
    Ct = Cin + hid
    assert four_hid == 4 * hid and Ct_w == Ct
    # The padding scheme below matches the PyTorch module only for odd kernels
    # (nn.Conv2d with padding=k//2 is symmetric only when k is odd).
    assert KH % 2 == 1 and KW % 2 == 1, "even kernel sizes not supported"

    ph, pw = KH // 2, KW // 2
    HW = H * W
    pad_lo = ph * W + pw
    HWp = HW + 2 * pad_lo
    Ctp = _round_up(Ct, 8)            # sublane-align every conv tap
    K = KH * KW * Ctp

    # --- wrapper glue: cheap reshapes/pads only, no NHWC transposes ---------
    comb = jnp.concatenate([x_nchw, h_nchw], axis=1).reshape(B, Ct, HW)
    comb = jnp.pad(comb, ((0, 0), (0, Ctp - Ct), (pad_lo, pad_lo)))
    comb = comb.astype(jnp.bfloat16)                         # (B, Ctp, HWp)

    c_flat = c_nchw.reshape(B, hid, HW).astype(jnp.float32)  # (B, hid, HW)

    w_p = jnp.pad(w_oihw, ((0, 0), (0, Ctp - Ct), (0, 0), (0, 0)))
    w_mat = jnp.transpose(w_p, (0, 2, 3, 1)).reshape(4 * hid, K)
    w_mat = w_mat.astype(jnp.bfloat16)                       # (4*hid, K)

    b2d = bias.reshape(4 * hid, 1).astype(jnp.float32)       # (4*hid, 1)

    kern = functools.partial(convlstm_cell_kernel, H=H, W=W, KH=KH, KW=KW,
                             Ctp=Ctp, hid=hid)

    out = pl.pallas_call(
        kern,
        out_shape=jax.ShapeDtypeStruct((B, 2 * hid, HW), x_nchw.dtype),
        grid_spec=pltpu.PrefetchScalarGridSpec(
            num_scalar_prefetch=0,
            grid=(B,),
            in_specs=[
                pl.BlockSpec((1, Ctp, HWp), lambda b: (b, 0, 0)),
                pl.BlockSpec((1, hid, HW), lambda b: (b, 0, 0)),
                pl.BlockSpec((4 * hid, K), lambda b: (0, 0)),
                pl.BlockSpec((4 * hid, 1), lambda b: (0, 0)),
            ],
            out_specs=pl.BlockSpec((1, 2 * hid, HW), lambda b: (b, 0, 0)),
        ),
        compiler_params=pltpu.CompilerParams(
            dimension_semantics=("parallel",),
            vmem_limit_bytes=64 * 1024 * 1024,
        ),
    )(comb, c_flat, w_mat, b2d)

    hc = out.reshape(B, 2 * hid, H, W)
    return hc[:, :hid], hc[:, hid:]


def convlstm_cell_reference(x, h, c, w_oihw, bias):
    """Plain-JAX reference mirroring the PyTorch module (NCHW, f32)."""
    comb = jnp.concatenate([x, h], axis=1)
    out = jax.lax.conv_general_dilated(
        comb, w_oihw, window_strides=(1, 1), padding="SAME",
        dimension_numbers=("NCHW", "OIHW", "NCHW"))
    out = out + bias[None, :, None, None]
    cc_i, cc_f, cc_o, cc_g = jnp.split(out, 4, axis=1)
    i = jax.nn.sigmoid(cc_i)
    f = jax.nn.sigmoid(cc_f)
    o = jax.nn.sigmoid(cc_o)
    g = jnp.tanh(cc_g)
    c_next = f * c + i * g
    h_next = o * jnp.tanh(c_next)
    return h_next, c_next


if __name__ == "__main__":
    # Module hyper-parameters (small synthetic setup)
    B, input_dim, hidden_dim = 2, 4, 8
    H, W = 16, 16
    kernel_size = (3, 3)

    key = jax.random.PRNGKey(0)
    kx, kh, kc, kw, kb = jax.random.split(key, 5)

    x = jax.random.normal(kx, (B, input_dim, H, W), jnp.float32)       # NCHW
    h_cur = jax.random.normal(kh, (B, hidden_dim, H, W), jnp.float32)  # NCHW
    c_cur = jax.random.normal(kc, (B, hidden_dim, H, W), jnp.float32)  # NCHW

    # Deterministic parameter init (nn.Conv2d shapes: (4*hid, in+hid, kh, kw))
    w_oihw = 0.1 * jax.random.normal(
        kw, (4 * hidden_dim, input_dim + hidden_dim, *kernel_size), jnp.float32)
    bias = 0.1 * jax.random.normal(kb, (4 * hidden_dim,), jnp.float32)

    h_next, c_next = jax.block_until_ready(
        convlstm_cell_forward(x, h_cur, c_cur, w_oihw, bias))

    h_ref, c_ref = convlstm_cell_reference(x, h_cur, c_cur, w_oihw, bias)

    assert h_next.shape == (B, hidden_dim, H, W)
    assert c_next.shape == (B, hidden_dim, H, W)
    # Tolerance accounts for bf16 MXU inputs (f32 accumulation / gate math /
    # c-state update); any structural bug (tap order, shift, mask) would
    # produce O(0.1-1) errors, far above this threshold.
    assert jnp.allclose(h_next, h_ref, atol=2e-2, rtol=2e-2)
    assert jnp.allclose(c_next, c_ref, atol=2e-2, rtol=2e-2)

    print("KERNEL_OK")
</pallas_src>

<mosaic_0001>
module attributes {stable_mosaic.version = 11 : i64} {
  func.func @convlstm_cell_kernel(%arg0: i32, %arg1: memref<1x16x290xbf16, #tpu.memory_space<vmem>>, %arg2: memref<1x8x256xf32, #tpu.memory_space<vmem>>, %arg3: memref<32x144xbf16, #tpu.memory_space<vmem>>, %arg4: memref<32x1xf32, #tpu.memory_space<vmem>>, %arg5: memref<1x16x256xf32, #tpu.memory_space<vmem>>) attributes {dimension_semantics = [#tpu.dimension_semantics<parallel>], iteration_bounds = array<i64: 2>, scalar_prefetch = 0 : i64, scratch_operands = 0 : i64, tpu.core_type = #tpu.core_type<tc>, window_params = [{transform_indices = @transform_0, window_bounds = array<i64: 1, 16, 290>}, {transform_indices = @transform_1, window_bounds = array<i64: 1, 8, 256>}, {pipeline_mode = #tpu.pipeline_mode<synchronous>, transform_indices = @transform_2, window_bounds = array<i64: 32, 144>}, {pipeline_mode = #tpu.pipeline_mode<synchronous>, transform_indices = @transform_3, window_bounds = array<i64: 32, 1>}, {transform_indices = @transform_4, window_bounds = array<i64: 1, 16, 256>}]} {
    %c0 = arith.constant 0 : index
    %c0_0 = arith.constant 0 : index
    %c0_1 = arith.constant 0 : index
    %0 = vector.load %arg1[%c0, %c0_0, %c0_1] : memref<1x16x290xbf16, #tpu.memory_space<vmem>>, vector<1x16x290xbf16>
    %1 = vector.shape_cast %0 : vector<1x16x290xbf16> to vector<16x290xbf16>
    %2 = tpu.iota {dimensions = array<i32: 1>} : vector<1x256xi32>
    %c16_i32 = arith.constant 16 : i32
    %c0_i32 = arith.constant 0 : i32
    %3 = arith.cmpi eq, %c16_i32, %c0_i32 : i32
    %c1_i32 = arith.constant 1 : i32
    %4 = arith.select %3, %c1_i32, %c16_i32 : i32
    %5 = vector.broadcast %4 : i32 to vector<1x256xi32>
    %6 = arith.remsi %2, %5 : vector<1x256xi32>
    %c0_i32_2 = arith.constant 0 : i32
    %7 = vector.broadcast %c0_i32_2 : i32 to vector<1x256xi32>
    %8 = arith.cmpi ne, %6, %7 : vector<1x256xi32>
    %c0_i32_3 = arith.constant 0 : i32
    %9 = vector.broadcast %c0_i32_3 : i32 to vector<1x256xi32>
    %10 = arith.cmpi slt, %6, %9 : vector<1x256xi32>
    %c0_i32_4 = arith.constant 0 : i32
    %11 = arith.cmpi slt, %4, %c0_i32_4 : i32
    %12 = vector.broadcast %11 : i1 to vector<1x256xi1>
    %13 = vector.broadcast %12 : vector<1x256xi1> to vector<1x256xi1>
    %14 = arith.xori %10, %13 : vector<1x256xi1>
    %15 = arith.andi %14, %8 : vector<1x256xi1>
    %16 = vector.broadcast %4 : i32 to vector<1x256xi32>
    %17 = arith.addi %6, %16 : vector<1x256xi32>
    %18 = arith.select %15, %17, %6 : vector<1x256xi1>, vector<1x256xi32>
    %19 = vector.extract_strided_slice %1 {offsets = [0, 0], sizes = [16, 256], strides = [1, 1]} : vector<16x290xbf16> to vector<16x256xbf16>
    %c-1_i32 = arith.constant -1 : i32
    %20 = vector.broadcast %c-1_i32 : i32 to vector<1x256xi32>
    %21 = arith.addi %18, %20 : vector<1x256xi32>
    %c0_i32_5 = arith.constant 0 : i32
    %22 = vector.broadcast %c0_i32_5 : i32 to vector<1x256xi32>
    %23 = arith.cmpi sge, %21, %22 : vector<1x256xi32>
    %c-1_i32_6 = arith.constant -1 : i32
    %24 = vector.broadcast %c-1_i32_6 : i32 to vector<1x256xi32>
    %25 = arith.addi %18, %24 : vector<1x256xi32>
    %c16_i32_7 = arith.constant 16 : i32
    %26 = vector.broadcast %c16_i32_7 : i32 to vector<1x256xi32>
    %27 = arith.cmpi slt, %25, %26 : vector<1x256xi32>
    %28 = arith.andi %23, %27 : vector<1x256xi1>
    %cst = arith.constant 0.000000e+00 : bf16
    %29 = vector.broadcast %cst : bf16 to vector<16x256xbf16>
    %30 = vector.shape_cast %28 : vector<1x256xi1> to vector<1x256xi1>
    %31 = vector.broadcast %30 : vector<1x256xi1> to vector<16x256xi1>
    %32 = arith.select %31, %19, %29 : vector<16x256xi1>, vector<16x256xbf16>
    %33 = vector.extract_strided_slice %1 {offsets = [0, 1], sizes = [16, 256], strides = [1, 1]} : vector<16x290xbf16> to vector<16x256xbf16>
    %34 = vector.extract_strided_slice %1 {offsets = [0, 2], sizes = [16, 256], strides = [1, 1]} : vector<16x290xbf16> to vector<16x256xbf16>
    %c1_i32_8 = arith.constant 1 : i32
    %35 = vector.broadcast %c1_i32_8 : i32 to vector<1x256xi32>
    %36 = arith.addi %18, %35 : vector<1x256xi32>
    %c0_i32_9 = arith.constant 0 : i32
    %37 = vector.broadcast %c0_i32_9 : i32 to vector<1x256xi32>
    %38 = arith.cmpi sge, %36, %37 : vector<1x256xi32>
    %c1_i32_10 = arith.constant 1 : i32
    %39 = vector.broadcast %c1_i32_10 : i32 to vector<1x256xi32>
    %40 = arith.addi %18, %39 : vector<1x256xi32>
    %c16_i32_11 = arith.constant 16 : i32
    %41 = vector.broadcast %c16_i32_11 : i32 to vector<1x256xi32>
    %42 = arith.cmpi slt, %40, %41 : vector<1x256xi32>
    %43 = arith.andi %38, %42 : vector<1x256xi1>
    %cst_12 = arith.constant 0.000000e+00 : bf16
    %44 = vector.broadcast %cst_12 : bf16 to vector<16x256xbf16>
    %45 = vector.shape_cast %43 : vector<1x256xi1> to vector<1x256xi1>
    %46 = vector.broadcast %45 : vector<1x256xi1> to vector<16x256xi1>
    %47 = arith.select %46, %34, %44 : vector<16x256xi1>, vector<16x256xbf16>
    %48 = vector.extract_strided_slice %1 {offsets = [0, 16], sizes = [16, 256], strides = [1, 1]} : vector<16x290xbf16> to vector<16x256xbf16>
    %c-1_i32_13 = arith.constant -1 : i32
    %49 = vector.broadcast %c-1_i32_13 : i32 to vector<1x256xi32>
    %50 = arith.addi %18, %49 : vector<1x256xi32>
    %c0_i32_14 = arith.constant 0 : i32
    %51 = vector.broadcast %c0_i32_14 : i32 to vector<1x256xi32>
    %52 = arith.cmpi sge, %50, %51 : vector<1x256xi32>
    %c-1_i32_15 = arith.constant -1 : i32
    %53 = vector.broadcast %c-1_i32_15 : i32 to vector<1x256xi32>
    %54 = arith.addi %18, %53 : vector<1x256xi32>
    %c16_i32_16 = arith.constant 16 : i32
    %55 = vector.broadcast %c16_i32_16 : i32 to vector<1x256xi32>
    %56 = arith.cmpi slt, %54, %55 : vector<1x256xi32>
    %57 = arith.andi %52, %56 : vector<1x256xi1>
    %cst_17 = arith.constant 0.000000e+00 : bf16
    %58 = vector.broadcast %cst_17 : bf16 to vector<16x256xbf16>
    %59 = vector.shape_cast %57 : vector<1x256xi1> to vector<1x256xi1>
    %60 = vector.broadcast %59 : vector<1x256xi1> to vector<16x256xi1>
    %61 = arith.select %60, %48, %58 : vector<16x256xi1>, vector<16x256xbf16>
    %62 = vector.extract_strided_slice %1 {offsets = [0, 17], sizes = [16, 256], strides = [1, 1]} : vector<16x290xbf16> to vector<16x256xbf16>
    %63 = vector.extract_strided_slice %1 {offsets = [0, 18], sizes = [16, 256], strides = [1, 1]} : vector<16x290xbf16> to vector<16x256xbf16>
    %c1_i32_18 = arith.constant 1 : i32
    %64 = vector.broadcast %c1_i32_18 : i32 to vector<1x256xi32>
    %65 = arith.addi %18, %64 : vector<1x256xi32>
    %c0_i32_19 = arith.constant 0 : i32
    %66 = vector.broadcast %c0_i32_19 : i32 to vector<1x256xi32>
    %67 = arith.cmpi sge, %65, %66 : vector<1x256xi32>
    %c1_i32_20 = arith.constant 1 : i32
    %68 = vector.broadcast %c1_i32_20 : i32 to vector<1x256xi32>
    %69 = arith.addi %18, %68 : vector<1x256xi32>
    %c16_i32_21 = arith.constant 16 : i32
    %70 = vector.broadcast %c16_i32_21 : i32 to vector<1x256xi32>
    %71 = arith.cmpi slt, %69, %70 : vector<1x256xi32>
    %72 = arith.andi %67, %71 : vector<1x256xi1>
    %cst_22 = arith.constant 0.000000e+00 : bf16
    %73 = vector.broadcast %cst_22 : bf16 to vector<16x256xbf16>
    %74 = vector.shape_cast %72 : vector<1x256xi1> to vector<1x256xi1>
    %75 = vector.broadcast %74 : vector<1x256xi1> to vector<16x256xi1>
    %76 = arith.select %75, %63, %73 : vector<16x256xi1>, vector<16x256xbf16>
    %77 = vector.extract_strided_slice %1 {offsets = [0, 32], sizes = [16, 256], strides = [1, 1]} : vector<16x290xbf16> to vector<16x256xbf16>
    %c-1_i32_23 = arith.constant -1 : i32
    %78 = vector.broadcast %c-1_i32_23 : i32 to vector<1x256xi32>
    %79 = arith.addi %18, %78 : vector<1x256xi32>
    %c0_i32_24 = arith.constant 0 : i32
    %80 = vector.broadcast %c0_i32_24 : i32 to vector<1x256xi32>
    %81 = arith.cmpi sge, %79, %80 : vector<1x256xi32>
    %c-1_i32_25 = arith.constant -1 : i32
    %82 = vector.broadcast %c-1_i32_25 : i32 to vector<1x256xi32>
    %83 = arith.addi %18, %82 : vector<1x256xi32>
    %c16_i32_26 = arith.constant 16 : i32
    %84 = vector.broadcast %c16_i32_26 : i32 to vector<1x256xi32>
    %85 = arith.cmpi slt, %83, %84 : vector<1x256xi32>
    %86 = arith.andi %81, %85 : vector<1x256xi1>
    %cst_27 = arith.constant 0.000000e+00 : bf16
    %87 = vector.broadcast %cst_27 : bf16 to vector<16x256xbf16>
    %88 = vector.shape_cast %86 : vector<1x256xi1> to vector<1x256xi1>
    %89 = vector.broadcast %88 : vector<1x256xi1> to vector<16x256xi1>
    %90 = arith.select %89, %77, %87 : vector<16x256xi1>, vector<16x256xbf16>
    %91 = vector.extract_strided_slice %1 {offsets = [0, 33], sizes = [16, 256], strides = [1, 1]} : vector<16x290xbf16> to vector<16x256xbf16>
    %92 = vector.extract_strided_slice %1 {offsets = [0, 34], sizes = [16, 256], strides = [1, 1]} : vector<16x290xbf16> to vector<16x256xbf16>
    %c1_i32_28 = arith.constant 1 : i32
    %93 = vector.broadcast %c1_i32_28 : i32 to vector<1x256xi32>
    %94 = arith.addi %18, %93 : vector<1x256xi32>
    %c0_i32_29 = arith.constant 0 : i32
    %95 = vector.broadcast %c0_i32_29 : i32 to vector<1x256xi32>
    %96 = arith.cmpi sge, %94, %95 : vector<1x256xi32>
    %c1_i32_30 = arith.constant 1 : i32
    %97 = vector.broadcast %c1_i32_30 : i32 to vector<1x256xi32>
    %98 = arith.addi %18, %97 : vector<1x256xi32>
    %c16_i32_31 = arith.constant 16 : i32
    %99 = vector.broadcast %c16_i32_31 : i32 to vector<1x256xi32>
    %100 = arith.cmpi slt, %98, %99 : vector<1x256xi32>
    %101 = arith.andi %96, %100 : vector<1x256xi1>
    %cst_32 = arith.constant 0.000000e+00 : bf16
    %102 = vector.broadcast %cst_32 : bf16 to vector<16x256xbf16>
    %103 = vector.shape_cast %101 : vector<1x256xi1> to vector<1x256xi1>
    %104 = vector.broadcast %103 : vector<1x256xi1> to vector<16x256xi1>
    %105 = arith.select %104, %92, %102 : vector<16x256xi1>, vector<16x256xbf16>
    %106 = tpu.concatenate %32, %33, %47, %61, %62, %76, %90, %91, %105 in 0 : vector<16x256xbf16>, vector<16x256xbf16>, vector<16x256xbf16>, vector<16x256xbf16>, vector<16x256xbf16>, vector<16x256xbf16>, vector<16x256xbf16>, vector<16x256xbf16>, vector<16x256xbf16> -> vector<144x256xbf16>
    %c0_33 = arith.constant 0 : index
    %c0_34 = arith.constant 0 : index
    %107 = vector.load %arg3[%c0_33, %c0_34] : memref<32x144xbf16, #tpu.memory_space<vmem>>, vector<32x144xbf16>
    %cst_35 = arith.constant dense<0.000000e+00> : vector<32x256xf32>
    %108 = tpu.matmul %107, %106, %cst_35 {dimension_numbers = #tpu.dot_dimension_numbers<[1], [0], [0], [1], [0, 0, 1, 1], [], []>} : vector<32x144xbf16>, vector<144x256xbf16>, vector<32x256xf32> -> vector<32x256xf32>
    %c0_36 = arith.constant 0 : index
    %c0_37 = arith.constant 0 : index
    %109 = vector.load %arg4[%c0_36, %c0_37] : memref<32x1xf32, #tpu.memory_space<vmem>>, vector<32x1xf32>
    %110 = vector.broadcast %109 : vector<32x1xf32> to vector<32x256xf32>
    %111 = arith.addf %108, %110 : vector<32x256xf32>
    %112 = vector.extract_strided_slice %111 {offsets = [0, 0], sizes = [8, 256], strides = [1, 1]} : vector<32x256xf32> to vector<8x256xf32>
    %113 = vector.extract_strided_slice %111 {offsets = [8, 0], sizes = [8, 256], strides = [1, 1]} : vector<32x256xf32> to vector<8x256xf32>
    %114 = vector.extract_strided_slice %111 {offsets = [16, 0], sizes = [8, 256], strides = [1, 1]} : vector<32x256xf32> to vector<8x256xf32>
    %115 = vector.extract_strided_slice %111 {offsets = [24, 0], sizes = [8, 256], strides = [1, 1]} : vector<32x256xf32> to vector<8x256xf32>
    %116 = arith.negf %112 : vector<8x256xf32>
    %117 = math.exp %116 : vector<8x256xf32>
    %cst_38 = arith.constant 1.000000e+00 : f32
    %118 = vector.broadcast %cst_38 : f32 to vector<8x256xf32>
    %119 = arith.addf %118, %117 : vector<8x256xf32>
    %120 = arith.divf %118, %119 : vector<8x256xf32>
    %121 = arith.negf %113 : vector<8x256xf32>
    %122 = math.exp %121 : vector<8x256xf32>
    %cst_39 = arith.constant 1.000000e+00 : f32
    %123 = vector.broadcast %cst_39 : f32 to vector<8x256xf32>
    %124 = arith.addf %123, %122 : vector<8x256xf32>
    %125 = arith.divf %123, %124 : vector<8x256xf32>
    %126 = arith.negf %114 : vector<8x256xf32>
    %127 = math.exp %126 : vector<8x256xf32>
    %cst_40 = arith.constant 1.000000e+00 : f32
    %128 = vector.broadcast %cst_40 : f32 to vector<8x256xf32>
    %129 = arith.addf %128, %127 : vector<8x256xf32>
    %130 = arith.divf %128, %129 : vector<8x256xf32>
    %131 = math.tanh %115 : vector<8x256xf32>
    %c0_41 = arith.constant 0 : index
    %c0_42 = arith.constant 0 : index
    %c0_43 = arith.constant 0 : index
    %132 = vector.load %arg2[%c0_41, %c0_42, %c0_43] : memref<1x8x256xf32, #tpu.memory_space<vmem>>, vector<1x8x256xf32>
    %133 = vector.shape_cast %132 : vector<1x8x256xf32> to vector<8x256xf32>
    %134 = arith.mulf %125, %133 : vector<8x256xf32>
    %135 = arith.mulf %120, %131 : vector<8x256xf32>
    %136 = arith.addf %134, %135 : vector<8x256xf32>
    %137 = math.tanh %136 : vector<8x256xf32>
    %138 = arith.mulf %130, %137 : vector<8x256xf32>
    %139 = tpu.concatenate %138, %136 in 0 : vector<8x256xf32>, vector<8x256xf32> -> vector<16x256xf32>
    %c0_44 = arith.constant 0 : index
    %c0_45 = arith.constant 0 : index
    %c0_46 = arith.constant 0 : index
    %140 = vector.load %arg5[%c0_44, %c0_45, %c0_46] : memref<1x16x256xf32, #tpu.memory_space<vmem>>, vector<1x16x256xf32>
    %141 = vector.shape_cast %140 : vector<1x16x256xf32> to vector<16x256xf32>
    %142 = vector.shape_cast %139 : vector<16x256xf32> to vector<1x16x256xf32>
    tpu.vector_store %arg5[%c0_44, %c0_45, %c0_46], %142 {strides = array<i32>} : memref<1x16x256xf32, #tpu.memory_space<vmem>>, vector<1x16x256xf32>,
    return
  }
  func.func @transform_0(%arg0: i32) -> (i32, i32, i32) {
    %c0_i32 = arith.constant 0 : i32
    %c0_i32_0 = arith.constant 0 : i32
    %c0_i32_1 = arith.constant 0 : i32
    return %arg0, %c0_i32, %c0_i32_0 : i32, i32, i32
  }
  func.func @transform_1(%arg0: i32) -> (i32, i32, i32) {
    %c0_i32 = arith.constant 0 : i32
    %c0_i32_0 = arith.constant 0 : i32
    %c0_i32_1 = arith.constant 0 : i32
    return %arg0, %c0_i32, %c0_i32_0 : i32, i32, i32
  }
  func.func @transform_2(%arg0: i32) -> (i32, i32) {
    %c0_i32 = arith.constant 0 : i32
    %c0_i32_0 = arith.constant 0 : i32
    %c0_i32_1 = arith.constant 0 : i32
    return %c0_i32, %c0_i32_0 : i32, i32
  }
  func.func @transform_3(%arg0: i32) -> (i32, i32) {
    %c0_i32 = arith.constant 0 : i32
    %c0_i32_0 = arith.constant 0 : i32
    %c0_i32_1 = arith.constant 0 : i32
    return %c0_i32, %c0_i32_0 : i32, i32
  }
  func.func @transform_4(%arg0: i32) -> (i32, i32, i32) {
    %c0_i32 = arith.constant 0 : i32
    %c0_i32_0 = arith.constant 0 : i32
    %c0_i32_1 = arith.constant 0 : i32
    return %arg0, %c0_i32, %c0_i32_0 : i32, i32, i32
  }
}

</mosaic_0001>

<bundles_post_ra>
// kernel: tpu_custom_call.1
= control target key start
LH: loop header
LB: loop body
LE: loop exit
PB: predicated region body
PF: predicated region fallthrough
CT: control target
= control target key end

     0   :  { %9 = vsyncpa [#allocation3], 0  ;;  %s1473_s0 = inlined_call_operand.hbm [shape: bf16[2,16,290], index: 0, kind: input, shape index: {}]   ;;  %s1474_s1 = inlined_call_operand.vmem [shape: f32[2,8,256], index: 1, kind: input, shape index: {}]   ;;  %s1475_s2 = inlined_call_operand.hbm [shape: bf16[32,144], index: 2, kind: input, shape index: {}]   ;;  %s1476_s3 = inlined_call_operand.vmem [shape: f32[32,1], index: 3, kind: input, shape index: {}]   ;;  %s1477_s4 = inlined_call_operand.hbm [shape: f32[2,16,256], index: 4, kind: output, shape index: {}]  }
   0x1   :  { %11 = vsyncpa [#allocation3 + $0x1], 0 }
   0x2   :  { %12 = vsyncpa [#allocation6], 0 }
   0x3   :  { %13 = vsyncpa [#allocation4], 0 }
   0x4   :  { %15 = vsyncpa [#allocation4 + $0x1], 0  ;;  %s1175_s15 = smov 0   ;;  %s1177_s16 = smov 0  }
   0x5   :  { %s1179_s17 = smov 0   ;;  %s1181_s18 = smov 0  }
   0x6 LB: > { %s1196_s19 = sadd.s32 4294967295, %s1126_s18   ;;  %s815_s20 = sadd.s32 4294967294, %s1126_s18   ;;  %s1126_s18 = sphi %s1181_s18, %s1505_s18   ;;  %s1122_s17 = sphi %s1179_s17, %s1504_s17   ;;  %s1118_s16 = sphi %s1177_s16, %s1503_s16   ;;  %s1114_s15 = sphi %s1175_s15, %s1502_s15  }
   0x7   : > { %p41_p0 = scmp.ne.s32.totalorder %s1118_s16, %s1114_s15  ;;  %p1478_p1 = scmp.eq.s32.totalorder %s1196_s19, 0 }
   0x8   : > { %p139_p3 = scmp.eq.s32.totalorder %s815_s20, 1  ;;  %p816_p5 = scmp.ge.s32.totalorder %s1126_s18, 1 }
   0x9   : > { %p1205_p4 = por %p1478_p1, %p41_p0  ;;  %p146_p7 = scmp.lt.s32.totalorder %s1126_s18, 3 }
   0xa   : > { %p1210_p6 = por %p139_p3, %p41_p0  ;;  %s1128_s24 = smov [#allocation5]  }
   0xb   : > { %s1482_s21 = scalar_select %p1205_p4, 1, 0 }
   0xc   : > { %s1483_s22 = scalar_select %p1210_p6, 1, 0 }
   0xd   : > { %p1215_p8 = pnand %p816_p5, %p146_p7  ;;  %s158_s25 = sshll.u32 %s1128_s24, 4  ;;  %s159_s25 = int_to_ptr.vmem [resolvable:$true] %s158_s25 }
   0xe   : > { %s1229_s27 = sadd.s32 1, %s1126_s18   ;;  %s28_s28 = sadd.s32 1, %s1122_s17 }
   0xf   : > { %s1484_s23 = scalar_select %p1215_p8, 1, 0 }
  0x10   : > { %p893_p9 = pneg %p1215_p8  ;;  %s25_s29 = ssub.s32 %s1126_s18, %s1229_s27 }
  0x11   : > { %s1015_s30 = scalar_lea.vmem %s159_s25, 512  ;;  %p1023_p5 = scmp.lt.s32.totalorder %s159_s25, %s159_s25 }
  0x12   : > { %p1224_p11 = pnand %p893_p9, %p1478_p1  ;;  %p1016_p13 = scmp.ne.s32.totalorder %s159_s25, %s1015_s30 }
  0x13   : > { %p1024_p7 = scmp.lt.s32.totalorder %s1015_s30, %s1015_s30 }
  0x14   : > { %p1006_p12 = pneg %p1224_p11 }
  0x15   : > { %p1025_p10 = por %p1024_p7, %p1023_p5 }
  0x16   : > { %p1018_p0 = pnand %p1016_p13, %p1006_p12 }
  0x18   : > { %p1019_p3 = pneg %p1018_p0 }
  0x1a   : > { %p1026_p2 = pnand %p1025_p10, %p1019_p3 }
  0x1c   : > { %1029 = shalt.err (!%p1026_p2)
}
  0x1d   : > { %s1129_s5 = smov 128   ;;  %s1130_s6 = smov 8  }
  0x1e   : > { %896 = dma.hbm_to_vmem [thread:$0]  (!%p1224_p11), %s1475_s2, 512, %s159_s25, [#allocation6], %s1129_s5, %s1129_s5, %s1130_s6  }
  0x1f   : > { %p26_p9 = scmp.eq.s32.totalorder %s25_s29, 0  ;;  %p35_p12 = scmp.ne.s32.totalorder %s1122_s17, %s1118_s16 }
  0x20   : > { %p36_p10 = scmp.eq.s32.totalorder %s1126_s18, 0  ;;  %p906_p2 = scmp.lt.s32.totalorder %s1126_s18, 2 }
  0x21   : > { %s1246_s9 = scalar_select %p26_p9, %s1122_s17, %s28_s28  }
  0x22   : > { %p37_p13 = por %p36_p10, %p35_p12  ;;  %p1486_p0 = scmp.eq.s32.totalorder %s1196_s19, 1 }
  0x23   : > { %s175_s11 = sand.u32 1, %s1122_s17   ;;  %s883_s12 = smul.u32 384, %s1126_s18 }
  0x24   : > { %p1250_p3 = por %p1486_p0, %p35_p12  ;;  %s882_s13 = smul.u32 24, %s175_s11 }
  0x25   : > { %s1259_s24 = scalar_lea.hbm %s1473_s0, %s883_s12  ;;  %p1261_p11 = pnand %p906_p2, %p37_p13 }
  0x26   : > { %s1487_s10 = scalar_select %p1250_p3, 1, 0 }
  0x27   : > { %s179_s26 = scalar_lea.vmem [#allocation2], %s882_s13  ;;  %s1267_s29 = scalar_lea.sflag [#allocation3], %s175_s11 }
  0x28   : > { %s186_s28 = sshll.u32 %s179_s26, 4  ;;  %s1030_s30 = scalar_lea.hbm %s1259_s24, 384  ;;  %s1265_s28 = int_to_ptr.vmem [resolvable:$true] %s186_s28 }
  0x29   : > { %p1031_p5 = scmp.ne.s32.totalorder %s1259_s24, %s1030_s30  ;;  %p1032_p7 = pneg %p1261_p11 }
  0x2a   : > { %s1035_s7 = scalar_lea.hbm %s1473_s0, 768  ;;  %p1036_p10 = scmp.lt.s32.totalorder %s1259_s24, %s1473_s0 }
  0x2b   : > { %p1033_p9 = pnand %p1032_p7, %p1031_p5  ;;  %p1037_p2 = scmp.lt.s32.totalorder %s1035_s7, %s1030_s30 }
  0x2d   : > { %p1034_p12 = pneg %p1033_p9  ;;  %p1038_p13 = por %p1037_p2, %p1036_p10 }
  0x2f   : > { %p1039_p0 = pnand %p1038_p13, %p1034_p12 }
  0x31   : > { %1042 = shalt.err (!%p1039_p0)
}
  0x32   : > { %s1043_s11 = scalar_lea.vmem %s1265_s28, 384  ;;  %s1131_s13 = smov [#allocation2]  }
  0x33   : > { %p1044_p1 = scmp.ne.s32.totalorder %s1265_s28, %s1043_s11  ;;  %s1048_s14 = sshll.u32 %s1131_s13, 4  ;;  %s1049_s14 = int_to_ptr.vmem [resolvable:$false] %s1048_s14 }
  0x34   : > { %s1050_s20 = scalar_lea.vmem %s1049_s14, 768  ;;  %p1051_p9 = scmp.lt.s32.totalorder %s1265_s28, %s1049_s14 }
  0x35   : > { %p1046_p6 = pnand %p1044_p1, %p1032_p7  ;;  %p1052_p3 = scmp.lt.s32.totalorder %s1050_s20, %s1043_s11 }
  0x37   : > { %p1047_p5 = pneg %p1046_p6  ;;  %p1053_p4 = por %p1052_p3, %p1051_p9 }
  0x39   : > { %p1054_p8 = pnand %p1053_p4, %p1047_p5 }
  0x3b   : > { %1057 = shalt.err (!%p1054_p8)
}
  0x3c   : > { %s1132_s26 = smov 192   ;;  %s1133_s30 = smov 12  }
  0x3d   : > { %900 = dma.hbm_to_vmem [thread:$0]  (!%p1261_p11), %s1259_s24, 384, %s1265_s28, %s1267_s29, %s1132_s26, %s1132_s26, %s1133_s30  }
  0x3e   : > { %p1489_p1 = scmp.ne.s32.totalorder %s1484_s23, 0 }
  0x3f   : > { %s1291_s5 = sand.u32 (!%p1489_p1), 1, %s1118_s16   ;;  %p1490_p4 = scmp.ne.s32.totalorder (!%p1489_p1), %s1482_s21, 0 }
  0x40   : > { %206 = sbr.rel (%p1489_p1) target bundleno = 633 (0x279), region = 36  ;;  %s209_s7 = scalar_lea.sflag (!%p1489_p1), [#allocation3], %s1291_s5 }
  0x41   : > { %s884_s6 = smul.u32 (!%p1489_p1), 24, %s1291_s5 }
  0x43   : > { %s1295_s8 = scalar_lea.vmem (!%p1489_p1), [#allocation2], %s884_s6 }
  0x45   : > { %1101 = dma.done.wait (%p1490_p4), %s209_s7, 384  }
  0x46   : > { %1103 = vsyncadd (%p1490_p4), %s209_s7, 4294966912  ;;  %v258_v0 = vlaneseq  ;;  %p1491_p6 = scmp.eq.s32.totalorder %s1196_s19, 0 }
  0x48   : > { %1105 = dma.done.wait (%p1491_p6), [#allocation6], 512   ;;  %p1492_p8 = pmov %p1491_p6 }
  0x49   : > { %v1134_v1 = vmov 0   ;;  %v259_v2 = vand.u32 127, %v258_v0  ;;  %s1135_s21 = smov 16   ;;  %s1136_s23 = smov 32   ;;  %v1313_v13 = vld [vmem:[%s1295_s8] sm:$0xff]  ;;  %v1316_v14 = vld [vmem:[%s1295_s8 + $0xc] sm:$0xff] }
  0x4a   : > { %1107 = vsyncadd (%p1492_p8), [#allocation6], 4294966784  ;;  %961 = vset.pattern.permute.xlu1 %v1134_v1  ;;  %962 = vset.pattern.permute.xlu0 %v1134_v1  ;;  %s1137_s24 = smov 2   ;;  %s1138_s25 = smov 18   ;;  %v1320_v15 = vcombine.high %v1313_v13, %v1316_v14  ;;  %v1323_v16 = vld [vmem:[%s1295_s8 + $0x8] sm:$0xf]  ;;  %v1335_v19 = vcombine.low %v1313_v13, %v1316_v14 }
  0x4b   : > { %v260_v3 = vadd.s32 128, %v259_v2  ;;  %v265_v4 = vand.u32 15, %v259_v2  ;;  %v1326_v17 = vld [vmem:[%s1295_s8 + $0x14] sm:$0xf]  ;;  %s1139_s28 = smov 34   ;;  %s1140_s29 = smov 95  }
  0x4c   : > { %v1331_v18 = vcombine.low %v1323_v16, %v1326_v17  ;;  %s1141_s12 = smov 111   ;;  %vm351_vm7 = vcmask 261120   ;;  %vm340_vm8 = vcmask 146432   ;;  %s1142_s11 = smov 96   ;;  %vm517_vm13 = vcmask 777216  }
  0x4d   : > { %v272_v5 = vand.u32 15, %v260_v3  ;;  %v285_v6 = vadd.s32 4294967295, %v265_v4  ;;  %v300_v7 = vadd.s32 1, %v265_v4  ;;  %vm329_vm14 = vcmask 130048   ;;  %s1143_s13 = smov 126   ;;  %s1144_s14 = smov 110  }
  0x4e   : > { %s1145_s20 = smov 112   ;;  %s1146_s26 = smov 127  }
  0x4f   : > { %v286_v8 = vadd.s32 4294967295, %v272_v5  ;;  %vm287_vm0 = vcmp.ge.s32.totalorder %v285_v6, 0  ;;  %v301_v9 = vadd.s32 1, %v272_v5  ;;  %vm304_vm1 = vcmp.lt.s32.totalorder %v300_v7, 16  ;;  %s1147_s30 = smov 94   ;;  %p246_p3 = scmp.lt.s32.totalorder %s1196_s19, 1 }
  0x50   : > { %s863_s6 = sshll.u32 %s1196_s19, 9  ;;  %p1499_p7 = scmp.ne.s32.totalorder %s1487_s10, 0 }
  0x51   : > { %vm288_vm2 = vcmp.ge.s32.totalorder %v286_v8, 0  ;;  %vm305_vm3 = vcmp.lt.s32.totalorder %v301_v9, 16 }
  0x52   : > { %vm1305_vm4 = vmpackc.low %vm288_vm2, %vm287_vm0  ;;  %vm317_vm0 = vcmask 15360  }
  0x53   : > { %v325_v11 = vsel %vm1305_vm4, 65537, %v1134_v1  ;;  %vm312_vm5 = vmpackc.low %vm305_vm3, %vm304_vm1  ;;  %vm362_vm3 = vcmask 277504  }
  0x54   : > { %326 = vrot.lane.b32.xlu1 %v325_v11, %s1135_s21  ;;  %348 = vrot.lane.b32.xlu0 %v325_v11, %s1136_s23  ;;  %v313_v12 = vsel %vm312_vm5, 65537, %v1134_v1 }
  0x58   : > { %314 = vrot.lane.b32.xlu1 %v313_v12, %s1137_s24  ;;  %337 = vrot.lane.b32.xlu0 %v313_v12, %s1138_s25  ;;  %s1427_s24 = scalar_lea.hbm %s1477_s4, %s863_s6  ;;  %s707_s25 = scalar_lea.sflag [#allocation4], %s1291_s5 }
  0x5c   : > { %359 = vrot.lane.b32.xlu0 %v313_v12, %s1139_s28  ;;  %513 = vrot.lane.b32.xlu1 %v1320_v15, %s1140_s29  ;;  %v968_v12 = vld [vmem:[#allocation5 + $0x4] ss:$8 sps:$4 sm:$0xff]   ;;  %s1148_s28 = smov [#allocation7]  }
  0x5d   : > { %849 = vmatprep.mubr.msk.bf16.mxu0 %vm329_vm14, %v968_v12 }
  0x60   : > { %515 = vrot.lane.b32.xlu0 %v1331_v18, %s1140_s29  ;;  %511 = vrot.lane.b32.xlu1 %v1335_v19, %s1140_s29  ;;  %s1062_s29 = sshll.u32 %s1148_s28, 4  ;;  %s1063_s29 = int_to_ptr.vmem [resolvable:$false] %s1062_s29 }
  0x64   : > { %456 = vrot.lane.b32.xlu1 %v1331_v18, %s1141_s12  ;;  %454 = vrot.lane.b32.xlu0 %v1320_v15, %s1141_s12 }
  0xc6   : > { %v327_v20 = vpop.permute.xlu1 %326  ;;  %v349_v21 = vpop.permute.xlu0 %348 }
  0xc7   : > { %v350_v22 = vrot.slane %v349_v21, 4  ;;  %v328_v38 = vrot.slane %v327_v20, 4 }
  0xc9   : > { %vm354_vm6 = vcmp.ne.s16.totalorder %v350_v22, 0  ;;  %v352_v29 = vsel %vm351_vm7, %v350_v22, %v349_v21  ;;  %v330_v50 = vsel %vm329_vm14, %v328_v38, %v327_v20  ;;  %vm332_vm1 = vcmp.ne.s16.totalorder %v328_v38, 0  ;;  %v551_v21 = vld [vmem:[%s1476_s3 + $0x8] sm:$0xff] }
  0xca   : > { %v315_v23 = vpop.permute.xlu1 %314  ;;  %v338_v24 = vpop.permute.xlu0 %337  ;;  %v356_v25 = vsel %vm354_vm6, %v1323_v16, 0  ;;  %v358_v26 = vsel %vm354_vm6, %v1326_v17, 0  ;;  %vm353_vm12 = vcmp.ne.s16.totalorder %v352_v29, 0  ;;  %vm331_vm15 = vcmp.ne.s16.totalorder %v330_v50, 0 }
  0xcb   : > { %v316_v27 = vrot.slane %v315_v23, 4  ;;  %v339_v28 = vrot.slane %v338_v24, 4  ;;  %v841_v30 = vcombine.low %v356_v25, %v358_v26  ;;  %v355_v47 = vsel %vm353_vm12, %v1313_v13, 0 }
  0xcc   : > { %v357_v48 = vsel %vm353_vm12, %v1316_v14, 0  ;;  %v333_v55 = vsel %vm331_vm15, %v1313_v13, 0  ;;  %v335_v56 = vsel %vm331_vm15, %v1316_v14, 0  ;;  %v334_v60 = vsel %vm332_vm1, %v1323_v16, 0 }
  0xcd   : > { %vm1345_vm9 = vcmp.ne.s16.totalorder %v316_v27, 0  ;;  %v341_v32 = vsel %vm340_vm8, %v339_v28, %v338_v24  ;;  %vm1349_vm10 = vcmp.ne.s16.totalorder %v339_v28, 0  ;;  %504 = vrot.lane.b32.xlu1 %v841_v30, %s1142_s11  ;;  %v840_v53 = vcombine.high %v355_v47, %v357_v48 }
  0xce   : > { %v1353_v34 = vpop.permute.xlu0 %359  ;;  %v514_v35 = vpop.permute.xlu1 %513  ;;  %v322_v36 = vsel %vm1345_vm9, %v1323_v16, 0  ;;  %v324_v37 = vsel %vm1345_vm9, %v1326_v17, 0  ;;  %vm342_vm11 = vcmp.ne.s16.totalorder %v341_v32, 0  ;;  %v345_v39 = vsel %vm1349_vm10, %v1323_v16, 0 }
  0xcf   : > { %v347_v40 = vsel %vm1349_vm10, %v1326_v17, 0  ;;  %v832_v41 = vcombine.low %v322_v36, %v324_v37  ;;  %v344_v42 = vsel %vm342_vm11, %v1313_v13, 0  ;;  %v346_v43 = vsel %vm342_vm11, %v1316_v14, 0 }
  0xd0   : > { %v838_v44 = vcombine.low %v345_v39, %v347_v40  ;;  %v837_v52 = vcombine.high %v344_v42, %v346_v43  ;;  %v836_v54 = vcombine.low %v344_v42, %v346_v43  ;;  %v839_v57 = vcombine.low %v355_v47, %v357_v48 }
  0xd1   : > { %421 = vrot.lane.b32.xlu1 %v832_v41, %s1143_s13  ;;  %v318_v58 = vsel %vm317_vm0, %v316_v27, %v315_v23  ;;  %v834_v59 = vcombine.high %v333_v55, %v335_v56  ;;  %v336_v61 = vsel %vm332_vm1, %v1326_v17, 0  ;;  %v833_v62 = vcombine.low %v333_v55, %v335_v56 }
  0xd2   : > { %v516_v45 = vpop.permute.xlu0 %515  ;;  %v512_v46 = vpop.permute.xlu1 %511  ;;  %480 = vrot.lane.b32.xlu0 %v838_v44, %s1144_s14  ;;  %vm319_vm2 = vcmp.ne.s16.totalorder %v318_v58, 0  ;;  %v835_v63 = vcombine.low %v334_v60, %v336_v61  ;;  %v361_v2 = vrot.slane %v1353_v34, 4  ;;  %vm506_vm7 = vcmask 785408   ;;  %v966_v58 = vld [vmem:[#allocation5] ss:$8 sps:$4 sm:$0xff]  }
  0xd3   : > { %v519_v49 = vsel %vm517_vm13, %v514_v35, %v516_v45  ;;  %v518_v51 = vsel %vm517_vm13, %v512_v46, %v514_v35  ;;  %v321_v0 = vsel %vm319_vm2, %v1313_v13, 0  ;;  %v323_v1 = vsel %vm319_vm2, %v1316_v14, 0 }
  0xd4   : > { %599 = vmatprep.subr.bf16.mxu0 %v519_v49  ;;  %864 = vmatprep.subr.bf16.mxu1 %v519_v49  ;;  %vm365_vm5 = vcmp.ne.s16.totalorder %v361_v2, 0  ;;  %v831_v3 = vcombine.high %v321_v0, %v323_v1  ;;  %v363_v4 = vsel %vm362_vm3, %v361_v2, %v1353_v34  ;;  %v830_v7 = vcombine.low %v321_v0, %v323_v1 }
  0xd5   : > { %600 = vmatpush1.bf16.msra.mxu0 %v518_v51  ;;  %873 = vmatpush1.bf16.msra.mxu1 %v518_v51  ;;  %v367_v5 = vsel %vm365_vm5, %v1323_v16, 0  ;;  %v369_v6 = vsel %vm365_vm5, %v1326_v17, 0  ;;  %vm364_vm6 = vcmp.ne.s16.totalorder %v363_v4, 0  ;;  %v550_v17 = vld [vmem:[%s1476_s3] sm:$0xff]  ;;  %vm482_vm8 = vcmask 900096  }
  0xd6   : > { %478 = vrot.lane.b32.xlu1 %v837_v52, %s1144_s14  ;;  %502 = vrot.lane.b32.xlu0 %v840_v53, %s1142_s11  ;;  %v844_v8 = vcombine.low %v367_v5, %v369_v6  ;;  %v366_v9 = vsel %vm364_vm6, %v1313_v13, 0  ;;  %v368_v11 = vsel %vm364_vm6, %v1316_v14, 0  ;;  %v457_v22 = vpop.permute.xlu1 %456  ;;  %v455_v23 = vpop.permute.xlu0 %454  ;;  %vm458_vm9 = vcmask 908288  }
  0xd7   : > { %v843_v16 = vcombine.high %v366_v9, %v368_v11  ;;  %v842_v20 = vcombine.low %v366_v9, %v368_v11  ;;  %v460_v37 = vsel %vm458_vm9, %v455_v23, %v457_v22  ;;  %vm447_vm10 = vcmask 916480  }
  0xd8   : > { %vm423_vm11 = vcmask 1031168   ;;  %v298_v48 = vsel %vm1305_vm4, %v1313_v13, 0  ;;  %v299_v49 = vsel %vm1305_vm4, %v1316_v14, 0  ;;  %vm399_vm12 = vcmask 1039360  }
  0xd9   : > { %v826_v52 = vcombine.high %v298_v48, %v299_v49  ;;  %v825_v55 = vcombine.low %v298_v48, %v299_v49  ;;  %vm541_vm13 = vcmask 769024  }
  0xda   : > { %476 = vrot.lane.b32.xlu1 %v836_v54, %s1144_s14  ;;  %500 = vrot.lane.b32.xlu0 %v839_v57, %s1142_s11 }
  0xde   : > { %443 = vrot.lane.b32.xlu1 %v834_v59, %s1145_s20  ;;  %452 = vrot.lane.b32.xlu0 %v1335_v19, %s1141_s12  ;;  %v969_v59 = vld [vmem:[#allocation5 + $0x10] ss:$8 sps:$4 sm:$0xff]   ;;  %s247_s12 = scalar_select %p246_p3, %s1196_s19, 1 }
  0xe0   : > { %s862_s11 = sshll.u32 %s247_s12, 4  ;;  %s1064_s12 = scalar_lea.vmem %s1063_s29, 1024 }
  0xe2   : > { %441 = vrot.lane.b32.xlu1 %v833_v62, %s1145_s20  ;;  %445 = vrot.lane.b32.xlu0 %v835_v63, %s1145_s20  ;;  %s250_s20 = scalar_lea.vmem %s1474_s1, %s862_s11 }
  0xe6   : > { %395 = vrot.lane.b32.xlu1 %v1320_v15, %s1146_s26  ;;  %419 = vrot.lane.b32.xlu0 %v831_v3, %s1143_s13  ;;  %v971_v15 = vld [vmem:[#allocation5 + $0x14] ss:$8 sps:$4 sm:$0xff]  }
  0xe7   : > { %850 = vmatprep.mubr.msk.bf16.mxu1 %vm329_vm14, %v971_v15 }
  0xea   : > { %393 = vrot.lane.b32.xlu1 %v1335_v19, %s1146_s26  ;;  %417 = vrot.lane.b32.xlu0 %v830_v7, %s1143_s13  ;;  %v552_v19 = vld [vmem:[%s1476_s3 + $0x10] sm:$0xff] }
  0xee   : > { %539 = vrot.lane.b32.xlu1 %v844_v8, %s1147_s30  ;;  %397 = vrot.lane.b32.xlu0 %v1331_v18, %s1146_s26  ;;  %v553_v18 = vld [vmem:[%s1476_s3 + $0x18] sm:$0xff]  ;;  %s822_s26 = sshll.u32 %s1291_s5, 5 }
  0xf2   : > { %556 = vperm.xlu1 %961, %v550_v17   ;;  %537 = vrot.lane.b32.xlu0 %v843_v16, %s1147_s30 }
  0xf6   : > { %566 = vperm.xlu1 %961, %v552_v19   ;;  %535 = vrot.lane.b32.xlu0 %v842_v20, %s1147_s30  ;;  %s245_s30 = scalar_lea.vmem [#allocation7], %s822_s26 }
  0xf7   : > { %s720_s7 = sshll.u32 %s245_s30, 4  ;;  %s1429_s7 = int_to_ptr.vmem [resolvable:$true] %s720_s7 }
  0xf8   : > { %s1058_s19 = scalar_lea.vmem %s1429_s7, 512  ;;  %p1065_p2 = scmp.lt.s32.totalorder %s1429_s7, %s1063_s29 }
  0xf9   : > { %p1059_p11 = scmp.ne.s32.totalorder %s1429_s7, %s1058_s19  ;;  %p1066_p13 = scmp.lt.s32.totalorder %s1064_s12, %s1058_s19 }
  0xfa   : > { %571 = vperm.xlu1 %961, %v553_v18   ;;  %561 = vperm.xlu0 %962, %v551_v21  }
  0xfb   : > { %p1060_p12 = pnand %p1059_p11, %p1499_p7  ;;  %p1067_p0 = por %p1066_p13, %p1065_p2 }
  0xfd   : > { %p1061_p10 = pneg %p1060_p12 }
  0xff   : > { %p1068_p5 = pnand %p1067_p0, %p1061_p10 }
 0x13f   : > { %v505_v24 = vpop.permute.xlu1 %504 }
 0x143   : > { %v422_v25 = vpop.permute.xlu1 %421 }
 0x144   : > { %v481_v26 = vpop.permute.xlu0 %480 }
 0x148   : > { %v479_v27 = vpop.permute.xlu1 %478  ;;  %v503_v28 = vpop.permute.xlu0 %502 }
 0x149   : > { %v508_v29 = vsel %vm506_vm7, %v503_v28, %v505_v24  ;;  %v484_v33 = vsel %vm482_vm8, %v479_v27, %v481_v26 }
 0x14a   : > { %601 = vmatprep.subr.bf16.mxu0 %v508_v29  ;;  %865 = vmatprep.subr.bf16.mxu1 %v508_v29 }
 0x14c   : > { %v477_v30 = vpop.permute.xlu1 %476  ;;  %v501_v31 = vpop.permute.xlu0 %500 }
 0x14d   : > { %v507_v32 = vsel %vm506_vm7, %v501_v31, %v503_v28  ;;  %v483_v36 = vsel %vm482_vm8, %v477_v30, %v479_v27 }
 0x14e   : > { %602 = vmatpush1.bf16.msra.mxu0 %v507_v32  ;;  %874 = vmatpush1.bf16.msra.mxu1 %v507_v32 }
 0x14f   : > { %603 = vmatprep.subr.bf16.mxu0 %v484_v33  ;;  %866 = vmatprep.subr.bf16.mxu1 %v484_v33 }
 0x150   : > { %v444_v34 = vpop.permute.xlu1 %443  ;;  %v453_v35 = vpop.permute.xlu0 %452 }
 0x151   : > { %v459_v40 = vsel %vm458_vm9, %v453_v35, %v455_v23 }
 0x152   : > { %604 = vmatpush1.bf16.msra.mxu0 %v483_v36  ;;  %875 = vmatpush1.bf16.msra.mxu1 %v483_v36 }
 0x153   : > { %605 = vmatprep.subr.bf16.mxu0 %v460_v37  ;;  %867 = vmatprep.subr.bf16.mxu1 %v460_v37  ;;  %v690_v37 = vld [vmem:[%s250_s20] sm:$0xff] }
 0x154   : > { %v442_v38 = vpop.permute.xlu1 %441  ;;  %v446_v39 = vpop.permute.xlu0 %445 }
 0x155   : > { %v449_v41 = vsel %vm447_vm10, %v444_v34, %v446_v39  ;;  %v448_v44 = vsel %vm447_vm10, %v442_v38, %v444_v34 }
 0x156   : > { %606 = vmatpush1.bf16.msra.mxu0 %v459_v40  ;;  %876 = vmatpush1.bf16.msra.mxu1 %v459_v40 }
 0x157   : > { %607 = vmatprep.subr.bf16.mxu0 %v449_v41  ;;  %868 = vmatprep.subr.bf16.mxu1 %v449_v41  ;;  %v691_v41 = vld [vmem:[%s250_s20 + $0x8] sm:$0xff] }
 0x158   : > { %v420_v42 = vpop.permute.xlu0 %419  ;;  %v396_v43 = vpop.permute.xlu1 %395 }
 0x159   : > { %v425_v45 = vsel %vm423_vm11, %v420_v42, %v422_v25 }
 0x15a   : > { %608 = vmatpush1.bf16.msra.mxu0 %v448_v44  ;;  %877 = vmatpush1.bf16.msra.mxu1 %v448_v44 }
 0x15b   : > { %609 = vmatprep.subr.bf16.mxu0 %v425_v45  ;;  %869 = vmatprep.subr.bf16.mxu1 %v425_v45 }
 0x15c   : > { %v418_v46 = vpop.permute.xlu0 %417  ;;  %v394_v50 = vpop.permute.xlu1 %393 }
 0x15d   : > { %v424_v47 = vsel %vm423_vm11, %v418_v46, %v420_v42  ;;  %v400_v54 = vsel %vm399_vm12, %v394_v50, %v396_v43 }
 0x15e   : > { %610 = vmatpush1.bf16.msra.mxu0 %v424_v47  ;;  %878 = vmatpush1.bf16.msra.mxu1 %v424_v47 }
 0x160   : > { %v398_v51 = vpop.permute.xlu0 %397  ;;  %v540_v56 = vpop.permute.xlu1 %539 }
 0x161   : > { %v401_v53 = vsel %vm399_vm12, %v396_v43, %v398_v51 }
 0x162   : > { %611 = vmatprep.subr.bf16.mxu0 %v401_v53  ;;  %870 = vmatprep.subr.bf16.mxu1 %v401_v53 }
 0x163   : > { %612 = vmatpush1.bf16.msra.mxu0 %v400_v54  ;;  %879 = vmatpush1.bf16.msra.mxu1 %v400_v54 }
 0x164   : > { %v538_v57 = vpop.permute.xlu0 %537  ;;  %613 = vmatprep.subr.bf16.mxu0 %v826_v52  ;;  %871 = vmatprep.subr.bf16.mxu1 %v826_v52 }
 0x165   : > { %v543_v10 = vsel %vm541_vm13, %v538_v57, %v540_v56 }
 0x167   : > { %614 = vmatpush1.bf16.msra.mxu0 %v825_v55  ;;  %880 = vmatpush1.bf16.msra.mxu1 %v825_v55 }
 0x168   : > { %v536_v13 = vpop.permute.xlu0 %535  ;;  %629 = vmatprep.subr.bf16.mxu0 %v543_v10  ;;  %872 = vmatprep.subr.bf16.mxu1 %v543_v10 }
 0x169   : > { %v542_v14 = vsel %vm541_vm13, %v536_v13, %v538_v57 }
 0x16b   : > { %630 = vmatpush2.bf16.msra.mxu0 %v542_v14  ;;  %881 = vmatpush2.bf16.msra.mxu1 %v542_v14 }
 0x16d   : > { %v557_v60 = vpop.permute.xlu1 %556 }
 0x16e   : > { %632 = vmatmul.mubr.bf16.vlgmr.msra.gmra.mxu0 %v966_v58  ;;  %642 = vmatmul.mubr.bf16.vlgmr.msra.gmra.mxu1 %v969_v59 }
 0x171   : > { %v567_v11 = vpop.permute.xlu1 %566 }
 0x175   : > { %v562_v0 = vpop.permute.xlu0 %561  ;;  %v572_v20 = vpop.permute.xlu1 %571 }
 0x22e   : > { %v633_v61 = vpop.f32.mrf.mxu0  ;;  %v643_v7 = vpop.f32.mrf.mxu1 }
 0x22f   : > { %v634_v62 = vadd.f32 %v633_v61, %v557_v60  ;;  %v644_v16 = vadd.f32 %v643_v7, %v567_v11 }
 0x230   : > { %v635_v63 = vpop.f32.mrf.mxu0  ;;  %v645_v15 = vpop.f32.mrf.mxu1 }
 0x231   : > { %v851_v1 = vmul.f32 -1.442695, %v634_v62  ;;  %v636_v2 = vadd.f32 %v635_v63, %v557_v60  ;;  %v646_v17 = vadd.f32 %v645_v15, %v567_v11  ;;  %v855_v18 = vmul.f32 -1.442695, %v644_v16 }
 0x232   : > { %v637_v3 = vpop.f32.mrf.mxu0  ;;  %v647_v19 = vpop.f32.mrf.mxu1 }
 0x233   : > { %972 = vpow2.f32 %v851_v1  ;;  %v852_v4 = vmul.f32 -1.442695, %v636_v2  ;;  %v638_v5 = vadd.f32 %v637_v3, %v562_v0  ;;  %v856_v21 = vmul.f32 -1.442695, %v646_v17 }
 0x234   : > { %v639_v6 = vpop.f32.mrf.mxu0  ;;  %v648_v23 = vadd.f32 %v647_v19, %v572_v20  ;;  %v649_v25 = vpop.f32.mrf.mxu1 }
 0x235   : > { %974 = vpow2.f32 %v852_v4  ;;  %v853_v8 = vmul.f32 -1.442695, %v638_v5  ;;  %v640_v9 = vadd.f32 %v639_v6, %v562_v0  ;;  %v650_v29 = vadd.f32 %v649_v25, %v572_v20 }
 0x237   : > { %976 = vpow2.f32 %v853_v8  ;;  %v854_v12 = vmul.f32 -1.442695, %v640_v9 }
 0x239   : > { %978 = vpow2.f32 %v854_v12 }
 0x23a   : > { %980 = vpow2.f32 %v855_v18 }
 0x23b   : > { %982 = vpow2.f32 %v856_v21 }
 0x23c   : > { %984 = vtanh.f32 %v648_v23 }
 0x240   : > { %v973_v22 = vpop.eup %972 }
 0x241   : > { %v658_v24 = vadd.f32 1.0, %v973_v22 }
 0x242   : > { %v975_v26 = vpop.eup %974 }
 0x243   : > { %v659_v27 = vadd.f32 1.0, %v975_v26  ;;  %986 = vrcp.f32 %v658_v24 }
 0x244   : > { %v977_v28 = vpop.eup %976 }
 0x245   : > { %v670_v30 = vadd.f32 1.0, %v977_v28  ;;  %988 = vrcp.f32 %v659_v27 }
 0x246   : > { %v979_v31 = vpop.eup %978 }
 0x247   : > { %990 = vrcp.f32 %v670_v30  ;;  %v671_v32 = vadd.f32 1.0, %v979_v31  ;;  %v981_v33 = vpop.eup %980 }
 0x248   : > { %992 = vtanh.f32 %v650_v29  ;;  %v983_v34 = vpop.eup %982  ;;  %v682_v40 = vadd.f32 1.0, %v981_v33 }
 0x249   : > { %994 = vrcp.f32 %v671_v32  ;;  %v985_v35 = vpop.eup %984  ;;  %v683_v46 = vadd.f32 1.0, %v983_v34 }
 0x24a   : > { %996 = vrcp.f32 %v682_v40 }
 0x250   : > { %v987_v36 = vpop.eup %986 }
 0x251   : > { %v694_v44 = vmul.f32 %v987_v36, %v985_v35 }
 0x252   : > { %v989_v38 = vpop.eup %988 }
 0x254   : > { %v991_v39 = vpop.eup %990 }
 0x255   : > { %v993_v42 = vpop.eup %992  ;;  %v692_v43 = vmul.f32 %v991_v39, %v690_v37 }
 0x256   : > { %v995_v45 = vpop.eup %994  ;;  %v695_v49 = vmul.f32 %v993_v42, %v989_v38 }
 0x257   : > { %v696_v47 = vadd.f32 %v694_v44, %v692_v43  ;;  %v693_v48 = vmul.f32 %v995_v45, %v691_v41  ;;  %v997_v51 = vpop.eup %996 }
 0x259   : > { %998 = vtanh.f32 %v696_v47  ;;  %704 = vst [vmem:[%s245_s30 + $0x10] sm:$0xff] %v696_v47  ;;  %v697_v50 = vadd.f32 %v695_v49, %v693_v48 }
 0x25a   : > { %1000 = vrcp.f32 %v683_v46 }
 0x25b   : > { %1002 = vtanh.f32 %v697_v50  ;;  %705 = vst [vmem:[%s245_s30 + $0x18] sm:$0xff] %v697_v50 }
 0x266   : > { %v999_v52 = vpop.eup %998 }
 0x267   : > { %v1001_v53 = vpop.eup %1000  ;;  %v700_v54 = vmul.f32 %v999_v52, %v997_v51 }
 0x268   : > { %v1003_v55 = vpop.eup %1002 }
 0x269   : > { %v701_v56 = vmul.f32 %v1003_v55, %v1001_v53  ;;  %702 = vst [vmem:[%s245_s30] sm:$0xff] %v700_v54 }
 0x26b   : > { %703 = vst [vmem:[%s245_s30 + $0x8] sm:$0xff] %v701_v56 }
 0x26c   : > { %1071 = shalt.err (!%p1068_p5)
}
 0x26d   : > { %s1072_s11 = scalar_lea.hbm %s1427_s24, 512  ;;  %s1076_s20 = scalar_lea.hbm %s1477_s4, 1024 }
 0x26e   : > { %p1073_p9 = scmp.ne.s32.totalorder %s1427_s24, %s1072_s11  ;;  %p1077_p6 = scmp.lt.s32.totalorder %s1427_s24, %s1477_s4 }
 0x26f   : > { %p1078_p8 = scmp.lt.s32.totalorder %s1076_s20, %s1072_s11 }
 0x270   : > { %p1074_p1 = pnand %p1073_p9, %p1499_p7 }
 0x271   : > { %p1079_p3 = por %p1078_p8, %p1077_p6 }
 0x272   : > { %p1075_p4 = pneg %p1074_p1 }
 0x274   : > { %p1080_p11 = pnand %p1079_p3, %p1075_p4 }
 0x276   : > { %1083 = shalt.err (!%p1080_p11)
}
 0x277   : > { %s1149_s6 = smov 256  }
 0x278   : > { %891 = dma.vmem_to_hbm [thread:$0]  (%p1499_p7), %s1429_s7, 512, %s1427_s24, %s707_s25, %s1149_s6, %s1149_s6, %s1135_s21  }
 0x279 PF: > { %s735_s8 = sand.u32 1, %s1114_s15   ;;  %p1500_p12 = scmp.ne.s32.totalorder %s1483_s22, 0 }
 0x27a   : > { %p1501_p10 = scmp.ge.s32.totalorder %s1126_s18, 2  ;;  %s736_s23 = scalar_lea.sflag [#allocation4], %s735_s8 }
 0x27c   : > { %p902_p2 = pnand %p1501_p10, %p1500_p12 }
 0x27e   : > { %p903_p13 = pneg %p902_p2 }
 0x280   : > { %1109 = dma.done.wait (%p903_p13), %s736_s23, 512  }
 0x281   : > { %1111 = vsyncadd (%p903_p13), %s736_s23, 4294966784  ;;  %p18_p0 = scmp.ge.s32.totalorder %s1229_s27, 4   ;;  %s1502_s15 = smov %s1118_s16 }
 0x282   : > { %s1503_s16 = smov %s1122_s17  ;;  %s1504_s17 = smov %s1246_s9 }
 0x283   : > { %s1505_s18 = smov %s1229_s27  ;;  %20 = sbr.rel (!%p18_p0) target bundleno = 6 (0x6), region = 88 }
 0x288   :  { %741 = vsyncpa [#allocation3], 1 }
 0x289   :  { %743 = vsyncpa [#allocation3 + $0x1], 1 }
 0x28a   :  { %744 = vsyncpa [#allocation6], 1 }
 0x28b   :  { %745 = vsyncpa [#allocation4], 1 }
 0x28c   :  { %747 = vsyncpa [#allocation4 + $0x1], 1 }

</bundles_post_ra>
